<compile_context>
chip_gen: v5e
topology: v5e:2x2
jax: 0.10.0
libtpu: 0.0.40
codegen_flags: <defaults>
</compile_context>

<pallas_src>
import functools

import jax
import jax.numpy as jnp
from jax.experimental import pallas as pl
from jax.experimental.pallas import tpu as pltpu


_VPU_CIN_MAX = 8             # tiny adapter channel counts -> VPU broadcast MACs
_STEP_BYTES_TARGET = 1 << 20  # amortize per-grid-step fixed overhead
_MAX_UNROLL_ROWS = 256        # cap on statically unrolled (image, row) matmuls


def _round_up(x, m):
    return ((x + m - 1) // m) * m


def _vmem_budget_bytes():
    """Generation-aware VMEM budget (v7x has only 64 MiB per TensorCore)."""
    cap = 64 * 1024 * 1024
    try:
        info = pltpu.get_tpu_info()
        cap = int(getattr(info, "vmem_capacity_bytes", cap) or cap)
    except Exception:
        pass
    # Leave headroom for compiler-internal scratch / spills.
    return min(int(cap * 0.6), 48 * 1024 * 1024)


def _choose_tiles(N, C_in, C_out, H_in, W_in, H_out, W_out, stride, elt, budget):
    """Pick (images per block, output rows per block, input rows per block)."""
    wpad_i = _round_up(W_in, 128)     # VMEM/DMA see lane-padded minor dims
    wpad_o = _round_up(W_out, 128)
    # Weight stays VMEM-resident; charged 2x because BlockSpec double-buffers
    # it even though its index_map is constant.
    # TODO(synk): pipeline_mode=pl.Buffered(1) on the weight once verified.
    weight_bytes = 2 * _round_up(C_out, 8) * _round_up(C_in, 128) * 4
    slack = 2 * 1024 * 1024           # f32 row temporaries, selection matrix
    avail = max(budget - weight_bytes - slack, 1 << 20)

    def per_image(th_out):
        th_in = H_in if th_out >= H_out else th_out * stride
        in_b = C_in * _round_up(th_in, 8) * wpad_i * elt
        out_b = C_out * _round_up(th_out, 8) * wpad_o * elt
        return 2 * (in_b + out_b)     # double-buffered input + output blocks

    # H tile: prefer the whole output height per block; otherwise a multiple of
    # 8 output rows (keeps the (8,128) block constraint on both operands).
    if H_out <= 8 or (per_image(H_out) <= avail and H_out <= _MAX_UNROLL_ROWS):
        th_out = H_out
    else:
        th_out = max(8, min((H_out // 8) * 8, _MAX_UNROLL_ROWS))
        while th_out > 8 and per_image(th_out) > avail:
            th_out -= 8
    th_in = H_in if th_out >= H_out else th_out * stride

    # Batch blocking: small feature maps move too few bytes per grid step, so
    # pack several images per block (restores useful DMA size per step).
    pib = max(per_image(th_out), 1)
    nb = max(1, min(N, _STEP_BYTES_TARGET // pib))
    nb = min(nb, max(1, _MAX_UNROLL_ROWS // max(th_out, 1)))
    while nb > 1 and nb * pib > avail:
        nb -= 1
    while N % nb:                      # keep N-blocks exact (no ragged batch)
        nb -= 1
    return nb, th_out, th_in


def _conv1x1_vpu_kernel(x_ref, w_ref, o_ref):
    """Tiny-C_in path (C_in <= 8, stride 1): VPU broadcast multiply-adds.

    x_ref: (NB, C_in, TH, W)   w_ref: (C_out, C_in)   o_ref: (NB, C_out, TH, W)
    """
    nb, c_in = x_ref.shape[0], x_ref.shape[1]
    w = w_ref[...].astype(jnp.float32)
    for b in range(nb):                                   # static unroll
        x = x_ref[b].astype(jnp.float32)                  # (C_in, TH, W)
        acc = w[:, 0:1, None] * x[0:1]                    # (C_out, TH, W)
        for ci in range(1, c_in):                         # static unroll
            acc = acc + w[:, ci:ci + 1, None] * x[ci:ci + 1]
        o_ref[b] = acc.astype(o_ref.dtype)


def _conv1x1_mxu_kernel(*refs, stride, has_sel):
    """General path: one MXU matmul per (image, output row), f32 accumulation.

    x_ref: (NB, C_in, TH_in, W_in)   w_ref: (C_out, C_in)
    [s_ref: (W_in, W_out) 0/1 column-selection matrix, only when stride > 1]
    o_ref: (NB, C_out, TH_out, W_out)

    The (C_in, W_in) row slice is a sublane-strided VMEM load, so C_in lands on
    the sublane axis without any in-kernel reshape/transpose of the NCHW block.
    """
    if has_sel:
        x_ref, w_ref, s_ref, o_ref = refs
        sel = s_ref[...]
    else:
        x_ref, w_ref, o_ref = refs
        sel = None
    nb = x_ref.shape[0]
    th_out = o_ref.shape[2]
    w = w_ref[...]
    for b in range(nb):                                   # static unroll
        for j in range(th_out):                           # static unroll
            row = x_ref[b, :, j * stride, :]              # (C_in, W_in)
            acc = jnp.dot(w, row, preferred_element_type=jnp.float32)
            if has_sel:                                   # W subsample (exact)
                acc = jnp.dot(acc, sel, preferred_element_type=jnp.float32)
            o_ref[b, :, j, :] = acc.astype(o_ref.dtype)


@functools.partial(jax.jit, static_argnames=("stride",))
def conv1x1_forward(x, weight, stride=1):
    """1x1 conv, NCHW input, PyTorch Conv2d weight (C_out, C_in, 1, 1), bias=False."""
    N, C_in, H_in, W_in = x.shape
    C_out = weight.shape[0]
    H_out = -(-H_in // stride)        # = floor((H-1)/stride) + 1 for k=1, pad=0
    W_out = -(-W_in // stride)

    w2 = weight.reshape(C_out, C_in)  # tiny, constant; negligible
    elt = x.dtype.itemsize
    budget = _vmem_budget_bytes()
    nb, th_out, th_in = _choose_tiles(
        N, C_in, C_out, H_in, W_in, H_out, W_out, stride, elt, budget)

    # Spatial axis first so the spatial tiles (not the possibly size-1 batch
    # axis) are what a v7x megacore splits across TensorCores.
    grid = (pl.cdiv(H_out, th_out), N // nb)

    in_specs = [
        pl.BlockSpec((nb, C_in, th_in, W_in), lambda h, n: (n, 0, h, 0)),
        pl.BlockSpec((C_out, C_in), lambda h, n: (0, 0)),
    ]
    args = [x, w2]

    use_vpu = (C_in <= _VPU_CIN_MAX) and (stride == 1)
    if use_vpu:
        kernel = _conv1x1_vpu_kernel
    else:
        has_sel = stride > 1
        if has_sel:
            # 0/1 column-selection matrix for the in-kernel W subsample.
            sel = (jnp.arange(W_in)[:, None]
                   == (jnp.arange(W_out) * stride)[None, :]).astype(jnp.float32)
            in_specs.append(pl.BlockSpec((W_in, W_out), lambda h, n: (0, 0)))
            args.append(sel)
        kernel = functools.partial(
            _conv1x1_mxu_kernel, stride=stride, has_sel=has_sel)

    out = pl.pallas_call(
        kernel,
        out_shape=jax.ShapeDtypeStruct((N, C_out, H_out, W_out), x.dtype),
        grid=grid,
        in_specs=in_specs,
        out_specs=pl.BlockSpec((nb, C_out, th_out, W_out),
                               lambda h, n: (n, 0, h, 0)),
        compiler_params=pltpu.CompilerParams(
            dimension_semantics=("parallel", "parallel"),
            vmem_limit_bytes=budget,
        ),
        cost_estimate=pl.CostEstimate(
            flops=2 * N * H_out * W_out * C_in * C_out,
            transcendentals=0,
            bytes_accessed=(N * C_in * H_in * W_in + C_in * C_out
                            + N * C_out * H_out * W_out) * elt,
        ),
    )(*args)
    return out


class Conv1x1:
    """JAX mirror of the PyTorch `conv1x1` module (parallel_adapters mode)."""

    def __init__(self, planes, out_planes=None, stride=1, key=None):
        if out_planes is None:
            out_planes = planes
        self.stride = stride
        key = jax.random.PRNGKey(0) if key is None else key
        # Deterministic init mimicking nn.Conv2d default (kaiming-uniform bound).
        fan_in = planes * 1 * 1
        bound = 1.0 / (fan_in ** 0.5)
        self.weight = jax.random.uniform(
            key, (out_planes, planes, 1, 1), jnp.float32, -bound, bound
        )

    def __call__(self, x):
        return conv1x1_forward(x, self.weight, stride=self.stride)


if __name__ == "__main__":
    key = jax.random.PRNGKey(0)
    kx1, kw1, kx2, kw2 = jax.random.split(key, 4)

    # --- Case 1: tiny-channel adapter shape (VPU path), stride 1 -------------
    N, C_in, H, W = 2, 4, 16, 16
    C_out, stride = 8, 1
    x = jax.random.normal(kx1, (N, C_in, H, W), jnp.float32)
    mod = Conv1x1(C_in, C_out, stride=stride, key=kw1)
    y = jax.block_until_ready(mod(x))
    w2d = mod.weight.reshape(C_out, C_in)
    ref = jnp.einsum("nchw,oc->nohw", x, w2d)
    assert y.shape == ref.shape, (y.shape, ref.shape)
    assert jnp.allclose(y, ref, atol=1e-5, rtol=1e-5)

    # --- Case 2: larger channels (MXU path), stride 2, odd spatial size ------
    N2, C_in2, H2, W2 = 1, 64, 15, 15
    C_out2, stride2 = 128, 2
    x2 = jax.random.normal(kx2, (N2, C_in2, H2, W2), jnp.float32)
    mod2 = Conv1x1(C_in2, C_out2, stride=stride2, key=kw2)
    y2 = jax.block_until_ready(mod2(x2))
    w2d2 = mod2.weight.reshape(C_out2, C_in2)
    ref2 = jnp.einsum("nchw,oc->nohw", x2[:, :, ::stride2, ::stride2], w2d2)
    assert y2.shape == ref2.shape, (y2.shape, ref2.shape)
    assert jnp.allclose(y2, ref2, atol=1e-4, rtol=1e-4)

    print("KERNEL_OK")
</pallas_src>

<mosaic_0001>
module attributes {stable_mosaic.version = 11 : i64} {
  func.func @_conv1x1_vpu_kernel(%arg0: i32, %arg1: i32, %arg2: memref<2x4x16x16xf32, #tpu.memory_space<vmem>>, %arg3: memref<8x4xf32, #tpu.memory_space<vmem>>, %arg4: memref<2x8x16x16xf32, #tpu.memory_space<vmem>>) attributes {dimension_semantics = [#tpu.dimension_semantics<parallel>, #tpu.dimension_semantics<parallel>], iteration_bounds = array<i64: 1, 1>, scalar_prefetch = 0 : i64, scratch_operands = 0 : i64, tpu.core_type = #tpu.core_type<tc>, window_params = [{transform_indices = @transform_0, window_bounds = array<i64: 2, 4, 16, 16>}, {pipeline_mode = #tpu.pipeline_mode<synchronous>, transform_indices = @transform_1, window_bounds = array<i64: 8, 4>}, {transform_indices = @transform_2, window_bounds = array<i64: 2, 8, 16, 16>}]} {
    %c0 = arith.constant 0 : index
    %c0_0 = arith.constant 0 : index
    %0 = vector.load %arg3[%c0, %c0_0] : memref<8x4xf32, #tpu.memory_space<vmem>>, vector<8x4xf32>
    %c0_1 = arith.constant 0 : index
    %c0_2 = arith.constant 0 : index
    %c0_3 = arith.constant 0 : index
    %c0_4 = arith.constant 0 : index
    %1 = vector.load %arg2[%c0_1, %c0_2, %c0_3, %c0_4] : memref<2x4x16x16xf32, #tpu.memory_space<vmem>>, vector<1x4x16x16xf32>
    %2 = vector.shape_cast %1 : vector<1x4x16x16xf32> to vector<4x16x16xf32>
    %3 = vector.extract_strided_slice %0 {offsets = [0, 0], sizes = [8, 1], strides = [1, 1]} : vector<8x4xf32> to vector<8x1xf32>
    %4 = vector.shape_cast %3 : vector<8x1xf32> to vector<8x1x1xf32>
    %5 = vector.extract_strided_slice %2 {offsets = [0, 0, 0], sizes = [1, 16, 16], strides = [1, 1, 1]} : vector<4x16x16xf32> to vector<1x16x16xf32>
    %6 = vector.broadcast %4 : vector<8x1x1xf32> to vector<8x16x16xf32>
    %7 = vector.broadcast %5 : vector<1x16x16xf32> to vector<8x16x16xf32>
    %8 = arith.mulf %6, %7 : vector<8x16x16xf32>
    %9 = vector.extract_strided_slice %0 {offsets = [0, 1], sizes = [8, 1], strides = [1, 1]} : vector<8x4xf32> to vector<8x1xf32>
    %10 = vector.shape_cast %9 : vector<8x1xf32> to vector<8x1x1xf32>
    %11 = vector.extract_strided_slice %2 {offsets = [1, 0, 0], sizes = [1, 16, 16], strides = [1, 1, 1]} : vector<4x16x16xf32> to vector<1x16x16xf32>
    %12 = vector.broadcast %10 : vector<8x1x1xf32> to vector<8x16x16xf32>
    %13 = vector.broadcast %11 : vector<1x16x16xf32> to vector<8x16x16xf32>
    %14 = arith.mulf %12, %13 : vector<8x16x16xf32>
    %15 = arith.addf %8, %14 : vector<8x16x16xf32>
    %16 = vector.extract_strided_slice %0 {offsets = [0, 2], sizes = [8, 1], strides = [1, 1]} : vector<8x4xf32> to vector<8x1xf32>
    %17 = vector.shape_cast %16 : vector<8x1xf32> to vector<8x1x1xf32>
    %18 = vector.extract_strided_slice %2 {offsets = [2, 0, 0], sizes = [1, 16, 16], strides = [1, 1, 1]} : vector<4x16x16xf32> to vector<1x16x16xf32>
    %19 = vector.broadcast %17 : vector<8x1x1xf32> to vector<8x16x16xf32>
    %20 = vector.broadcast %18 : vector<1x16x16xf32> to vector<8x16x16xf32>
    %21 = arith.mulf %19, %20 : vector<8x16x16xf32>
    %22 = arith.addf %15, %21 : vector<8x16x16xf32>
    %23 = vector.extract_strided_slice %0 {offsets = [0, 3], sizes = [8, 1], strides = [1, 1]} : vector<8x4xf32> to vector<8x1xf32>
    %24 = vector.shape_cast %23 : vector<8x1xf32> to vector<8x1x1xf32>
    %25 = vector.extract_strided_slice %2 {offsets = [3, 0, 0], sizes = [1, 16, 16], strides = [1, 1, 1]} : vector<4x16x16xf32> to vector<1x16x16xf32>
    %26 = vector.broadcast %24 : vector<8x1x1xf32> to vector<8x16x16xf32>
    %27 = vector.broadcast %25 : vector<1x16x16xf32> to vector<8x16x16xf32>
    %28 = arith.mulf %26, %27 : vector<8x16x16xf32>
    %29 = arith.addf %22, %28 : vector<8x16x16xf32>
    %c0_5 = arith.constant 0 : index
    %c0_6 = arith.constant 0 : index
    %c0_7 = arith.constant 0 : index
    %c0_8 = arith.constant 0 : index
    %30 = vector.load %arg4[%c0_5, %c0_6, %c0_7, %c0_8] : memref<2x8x16x16xf32, #tpu.memory_space<vmem>>, vector<1x8x16x16xf32>
    %31 = vector.shape_cast %30 : vector<1x8x16x16xf32> to vector<8x16x16xf32>
    %32 = vector.shape_cast %29 : vector<8x16x16xf32> to vector<1x8x16x16xf32>
    tpu.vector_store %arg4[%c0_5, %c0_6, %c0_7, %c0_8], %32 {strides = array<i32>} : memref<2x8x16x16xf32, #tpu.memory_space<vmem>>, vector<1x8x16x16xf32>,
    %c1 = arith.constant 1 : index
    %c0_9 = arith.constant 0 : index
    %c0_10 = arith.constant 0 : index
    %c0_11 = arith.constant 0 : index
    %33 = vector.load %arg2[%c1, %c0_9, %c0_10, %c0_11] : memref<2x4x16x16xf32, #tpu.memory_space<vmem>>, vector<1x4x16x16xf32>
    %34 = vector.shape_cast %33 : vector<1x4x16x16xf32> to vector<4x16x16xf32>
    %35 = vector.extract_strided_slice %0 {offsets = [0, 0], sizes = [8, 1], strides = [1, 1]} : vector<8x4xf32> to vector<8x1xf32>
    %36 = vector.shape_cast %35 : vector<8x1xf32> to vector<8x1x1xf32>
    %37 = vector.extract_strided_slice %34 {offsets = [0, 0, 0], sizes = [1, 16, 16], strides = [1, 1, 1]} : vector<4x16x16xf32> to vector<1x16x16xf32>
    %38 = vector.broadcast %36 : vector<8x1x1xf32> to vector<8x16x16xf32>
    %39 = vector.broadcast %37 : vector<1x16x16xf32> to vector<8x16x16xf32>
    %40 = arith.mulf %38, %39 : vector<8x16x16xf32>
    %41 = vector.extract_strided_slice %0 {offsets = [0, 1], sizes = [8, 1], strides = [1, 1]} : vector<8x4xf32> to vector<8x1xf32>
    %42 = vector.shape_cast %41 : vector<8x1xf32> to vector<8x1x1xf32>
    %43 = vector.extract_strided_slice %34 {offsets = [1, 0, 0], sizes = [1, 16, 16], strides = [1, 1, 1]} : vector<4x16x16xf32> to vector<1x16x16xf32>
    %44 = vector.broadcast %42 : vector<8x1x1xf32> to vector<8x16x16xf32>
    %45 = vector.broadcast %43 : vector<1x16x16xf32> to vector<8x16x16xf32>
    %46 = arith.mulf %44, %45 : vector<8x16x16xf32>
    %47 = arith.addf %40, %46 : vector<8x16x16xf32>
    %48 = vector.extract_strided_slice %0 {offsets = [0, 2], sizes = [8, 1], strides = [1, 1]} : vector<8x4xf32> to vector<8x1xf32>
    %49 = vector.shape_cast %48 : vector<8x1xf32> to vector<8x1x1xf32>
    %50 = vector.extract_strided_slice %34 {offsets = [2, 0, 0], sizes = [1, 16, 16], strides = [1, 1, 1]} : vector<4x16x16xf32> to vector<1x16x16xf32>
    %51 = vector.broadcast %49 : vector<8x1x1xf32> to vector<8x16x16xf32>
    %52 = vector.broadcast %50 : vector<1x16x16xf32> to vector<8x16x16xf32>
    %53 = arith.mulf %51, %52 : vector<8x16x16xf32>
    %54 = arith.addf %47, %53 : vector<8x16x16xf32>
    %55 = vector.extract_strided_slice %0 {offsets = [0, 3], sizes = [8, 1], strides = [1, 1]} : vector<8x4xf32> to vector<8x1xf32>
    %56 = vector.shape_cast %55 : vector<8x1xf32> to vector<8x1x1xf32>
    %57 = vector.extract_strided_slice %34 {offsets = [3, 0, 0], sizes = [1, 16, 16], strides = [1, 1, 1]} : vector<4x16x16xf32> to vector<1x16x16xf32>
    %58 = vector.broadcast %56 : vector<8x1x1xf32> to vector<8x16x16xf32>
    %59 = vector.broadcast %57 : vector<1x16x16xf32> to vector<8x16x16xf32>
    %60 = arith.mulf %58, %59 : vector<8x16x16xf32>
    %61 = arith.addf %54, %60 : vector<8x16x16xf32>
    %c1_12 = arith.constant 1 : index
    %c0_13 = arith.constant 0 : index
    %c0_14 = arith.constant 0 : index
    %c0_15 = arith.constant 0 : index
    %62 = vector.load %arg4[%c1_12, %c0_13, %c0_14, %c0_15] : memref<2x8x16x16xf32, #tpu.memory_space<vmem>>, vector<1x8x16x16xf32>
    %63 = vector.shape_cast %62 : vector<1x8x16x16xf32> to vector<8x16x16xf32>
    %64 = vector.shape_cast %61 : vector<8x16x16xf32> to vector<1x8x16x16xf32>
    tpu.vector_store %arg4[%c1_12, %c0_13, %c0_14, %c0_15], %64 {strides = array<i32>} : memref<2x8x16x16xf32, #tpu.memory_space<vmem>>, vector<1x8x16x16xf32>,
    return
  }
  func.func @transform_0(%arg0: i32, %arg1: i32) -> (i32, i32, i32, i32) {
    %c0_i32 = arith.constant 0 : i32
    %c0_i32_0 = arith.constant 0 : i32
    %c0_i32_1 = arith.constant 0 : i32
    return %arg1, %c0_i32, %arg0, %c0_i32_0 : i32, i32, i32, i32
  }
  func.func @transform_1(%arg0: i32, %arg1: i32) -> (i32, i32) {
    %c0_i32 = arith.constant 0 : i32
    %c0_i32_0 = arith.constant 0 : i32
    %c0_i32_1 = arith.constant 0 : i32
    return %c0_i32, %c0_i32_0 : i32, i32
  }
  func.func @transform_2(%arg0: i32, %arg1: i32) -> (i32, i32, i32, i32) {
    %c0_i32 = arith.constant 0 : i32
    %c0_i32_0 = arith.constant 0 : i32
    %c0_i32_1 = arith.constant 0 : i32
    return %arg1, %c0_i32, %arg0, %c0_i32_0 : i32, i32, i32, i32
  }
}

</mosaic_0001>

<bundles_post_ra>
// kernel: conv1x1_forward.1
= control target key start
LH: loop header
LB: loop body
LE: loop exit
PB: predicated region body
PF: predicated region fallthrough
CT: control target
= control target key end

     0   :  { %7 = vsyncpa [#allocation3], 0  ;;  %s886_s0 = inlined_call_operand.hbm [shape: f32[2,4,16,16], index: 0, kind: input, shape index: {}]   ;;  %s887_s1 = inlined_call_operand.vmem [shape: f32[8,4], index: 1, kind: input, shape index: {}]   ;;  %s888_s2 = inlined_call_operand.hbm [shape: f32[2,8,16,16], index: 2, kind: output, shape index: {}]  }
   0x1   :  { %8 = vsyncpa [#allocation4], 0  ;;  %s13_s11 = sshll.u32 %s886_s0, 4  ;;  %s539_s12 = smov [#allocation2]   ;;  %s14_s11 = int_to_ptr.hbm [resolvable:$true] %s13_s11 }
   0x2   :  { %s15_s13 = sshll.u32 %s539_s12, 4  ;;  %s540_s14 = smov 128   ;;  %s16_s13 = int_to_ptr.vmem [resolvable:$true] %s15_s13 }
   0x3   :  { %s541_s15 = smov 8  }
   0x4   :  { %21 = dma.hbm_to_vmem [thread:$0]  %s14_s11, 2048, %s16_s13, [#allocation3], %s540_s14, %s540_s14, %s541_s15  }
   0x5   :  { %535 = dma.done.wait [#allocation3], 2048  }
   0x6   :  { %536 = vsyncadd [#allocation3], 4294965248  ;;  %v542_v0 = vmov 0   ;;  %v28_v1 = vld [vmem:[%s887_s1] sm:$0xff]  ;;  %v543_v17 = vmov 1   ;;  %v544_v18 = vmov 2  }
   0x7   :  { %475 = vset.pattern.permute.xlu0 %v542_v0  ;;  %477 = vset.pattern.permute.xlu2 %v542_v0  ;;  %v45_v2 = vperm.slane %v28_v1, 0  ;;  %v41_v3 = vrot.slane %v28_v1, 4  ;;  %v39_v4 = vrot.slane %v28_v1, 2  ;;  %v38_v7 = vrot.slane %v28_v1, 1  ;;  %v585_v35 = vld [vmem:[#allocation2] sm:$0xff]  ;;  %v587_v36 = vld [vmem:[#allocation2 + $0x10] sm:$0xff] }
   0x8   :  { %476 = vset.pattern.permute.xlu1 %v542_v0  ;;  %v42_v8 = vrot.slane %v28_v1, 5  ;;  %v40_v9 = vrot.slane %v28_v1, 3  ;;  %v43_v13 = vrot.slane %v28_v1, 6  ;;  %v44_v14 = vrot.slane %v28_v1, 7  ;;  %v589_v37 = vld [vmem:[#allocation2 + $0x18] sm:$0xff]  ;;  %v591_v38 = vld [vmem:[#allocation2 + $0x50] sm:$0xff] }
   0x9   :  { %54 = vperm.xlu0 %475, %v45_v2   ;;  %v49_v5 = vperm.slane %v41_v3, 0  ;;  %v47_v6 = vperm.slane %v39_v4, 0  ;;  %v46_v10 = vperm.slane %v38_v7, 0  ;;  %v545_v19 = vmov 3   ;;  %v593_v39 = vld [vmem:[#allocation2 + $0x58] sm:$0xff]  ;;  %v595_v40 = vld [vmem:[#allocation2 + $0x8] sm:$0xff] }
   0xa   :  { %v50_v11 = vperm.slane %v42_v8, 0  ;;  %v48_v12 = vperm.slane %v40_v9, 0  ;;  %v51_v15 = vperm.slane %v43_v13, 0  ;;  %v52_v16 = vperm.slane %v44_v14, 0  ;;  %v597_v41 = vld [vmem:[#allocation2 + $0x40] sm:$0xff]  ;;  %v599_v42 = vld [vmem:[#allocation2 + $0x48] sm:$0xff] }
   0xb   :  { %70 = vperm.xlu2 %477, %v49_v5   ;;  %62 = vperm.xlu1 %476, %v47_v6   ;;  %v619_v62 = vld [vmem:[#allocation2 + $0x20] sm:$0xff]  ;;  %v621_v63 = vld [vmem:[#allocation2 + $0x28] sm:$0xff]  ;;  %vm293_vm0 = vcmask 130048   ;;  %s546_s0 = smov [#allocation5]   ;;  %s454_s20 = sshll.u32 %s888_s2, 4  ;;  %s455_s20 = int_to_ptr.hbm [resolvable:$true] %s454_s20 }
   0xc   :  { %v627_v4 = vld [vmem:[#allocation2 + $0x60] sm:$0xff]  ;;  %s452_s1 = sshll.u32 %s546_s0, 4  ;;  %s453_s1 = int_to_ptr.vmem [resolvable:$true] %s452_s1 }
  0x11   :  { %58 = vperm.xlu0 %475, %v46_v10  }
  0x13   :  { %74 = vperm.xlu2 %477, %v50_v11   ;;  %66 = vperm.xlu1 %476, %v48_v12  }
  0x19   :  { %78 = vperm.xlu0 %475, %v51_v15  }
  0x1b   :  { %478 = vset.pattern.permute.xlu2 %v543_v17  ;;  %82 = vperm.xlu1 %476, %v52_v16  }
  0x1c   :  { %102 = vperm.xlu2 %478, %v45_v2  }
  0x21   :  { %479 = vset.pattern.permute.xlu0 %v543_v17 }
  0x22   :  { %106 = vperm.xlu0 %479, %v46_v10  }
  0x23   :  { %480 = vset.pattern.permute.xlu1 %v543_v17 }
  0x24   :  { %114 = vperm.xlu2 %478, %v48_v12   ;;  %110 = vperm.xlu1 %480, %v47_v6  }
  0x2a   :  { %126 = vperm.xlu0 %479, %v51_v15  }
  0x2c   :  { %122 = vperm.xlu2 %478, %v50_v11   ;;  %118 = vperm.xlu1 %480, %v49_v5  }
  0x32   :  { %482 = vset.pattern.permute.xlu0 %v544_v18 }
  0x33   :  { %170 = vperm.xlu0 %482, %v46_v10  }
  0x34   :  { %481 = vset.pattern.permute.xlu2 %v544_v18  ;;  %130 = vperm.xlu1 %480, %v52_v16  }
  0x35   :  { %166 = vperm.xlu2 %481, %v45_v2  }
  0x3b   :  { %190 = vperm.xlu0 %482, %v51_v15  }
  0x3c   :  { %483 = vset.pattern.permute.xlu1 %v544_v18 }
  0x3d   :  { %178 = vperm.xlu2 %481, %v48_v12   ;;  %174 = vperm.xlu1 %483, %v47_v6  }
  0x43   :  { %485 = vset.pattern.permute.xlu0 %v545_v19 }
  0x44   :  { %234 = vperm.xlu0 %485, %v46_v10  }
  0x45   :  { %186 = vperm.xlu2 %481, %v50_v11   ;;  %182 = vperm.xlu1 %483, %v49_v5  }
  0x4c   :  { %254 = vperm.xlu0 %485, %v51_v15  }
  0x4d   :  { %484 = vset.pattern.permute.xlu2 %v545_v19  ;;  %194 = vperm.xlu1 %483, %v52_v16  }
  0x4e   :  { %230 = vperm.xlu2 %484, %v45_v2  }
  0x55   :  { %486 = vset.pattern.permute.xlu1 %v545_v19 }
  0x56   :  { %242 = vperm.xlu2 %484, %v48_v12   ;;  %238 = vperm.xlu1 %486, %v47_v6  }
  0x5e   :  { %250 = vperm.xlu2 %484, %v50_v11   ;;  %246 = vperm.xlu1 %486, %v49_v5   ;;  %v629_v5 = vld [vmem:[#allocation2 + $0x68] sm:$0xff] }
  0x65   :  { %v571_v20 = vpop.permute.xlu2 %70 }
  0x66   :  { %893 = vst [vmem:[#allocation8_spill] sm:$0xff] %v571_v20  ;;  %258 = vperm.xlu1 %486, %v52_v16  }
  0x6d   :  { %v75_v21 = vpop.permute.xlu2 %74 }
  0x6e   :  { %v95_v54 = vmul.f32 %v75_v21, %v585_v35  ;;  %v96_v55 = vmul.f32 %v75_v21, %v595_v40  ;;  %v329_v56 = vmul.f32 %v597_v41, %v75_v21  ;;  %v330_v57 = vmul.f32 %v599_v42, %v75_v21 }
  0x76   :  { %v103_v22 = vpop.permute.xlu2 %102 }
  0x77   :  { %v133_v43 = vmul.f32 %v103_v22, %v587_v36  ;;  %v134_v44 = vmul.f32 %v103_v22, %v589_v37  ;;  %v335_v45 = vmul.f32 %v591_v38, %v103_v22  ;;  %v336_v46 = vmul.f32 %v593_v39, %v103_v22 }
  0x7b   :  { %v55_v23 = vpop.permute.xlu0 %54 }
  0x7c   :  { %v85_v48 = vmul.f32 %v55_v23, %v585_v35  ;;  %v86_v49 = vmul.f32 %v55_v23, %v595_v40  ;;  %v319_v50 = vmul.f32 %v597_v41, %v55_v23  ;;  %v320_v51 = vmul.f32 %v599_v42, %v55_v23 }
  0x7d   :  { %v573_v24 = vpop.permute.xlu1 %62 }
  0x7e   :  { %v115_v25 = vpop.permute.xlu2 %114  ;;  %v149_v58 = vadd.f32 %v133_v43, %v85_v48  ;;  %v150_v59 = vadd.f32 %v134_v44, %v86_v49  ;;  %v351_v60 = vadd.f32 %v335_v45, %v319_v50  ;;  %v352_v61 = vadd.f32 %v336_v46, %v320_v51  ;;  %v657_v48 = vld [vmem:[#allocation2 + $0x70] sm:$0xff] }
  0x7f   :  { %v139_v0 = vmul.f32 %v115_v25, %v587_v36  ;;  %v140_v1 = vmul.f32 %v115_v25, %v589_v37  ;;  %v341_v2 = vmul.f32 %v591_v38, %v115_v25  ;;  %v342_v3 = vmul.f32 %v593_v39, %v115_v25 }
  0x83   :  { %v59_v26 = vpop.permute.xlu0 %58 }
  0x84   :  { %v87_v10 = vmul.f32 %v59_v26, %v585_v35  ;;  %v88_v14 = vmul.f32 %v59_v26, %v595_v40  ;;  %v321_v15 = vmul.f32 %v597_v41, %v59_v26  ;;  %v646_v19 = vmul.f32 %v599_v42, %v59_v26  ;;  %v659_v26 = vld [vmem:[#allocation2 + $0x78] sm:$0xff] }
  0x85   :  { %v67_v27 = vpop.permute.xlu1 %66 }
  0x86   :  { %v123_v28 = vpop.permute.xlu2 %122  ;;  %v91_v6 = vmul.f32 %v67_v27, %v585_v35  ;;  %v92_v7 = vmul.f32 %v67_v27, %v595_v40  ;;  %v325_v8 = vmul.f32 %v597_v41, %v67_v27  ;;  %v326_v9 = vmul.f32 %v599_v42, %v67_v27  ;;  %v653_v27 = vld [vmem:[#allocation2 + $0x30] sm:$0xff] }
  0x87   :  { %v143_v11 = vmul.f32 %v123_v28, %v587_v36  ;;  %v144_v21 = vmul.f32 %v123_v28, %v589_v37  ;;  %v345_v22 = vmul.f32 %v591_v38, %v123_v28  ;;  %v346_v23 = vmul.f32 %v593_v39, %v123_v28 }
  0x88   :  { %v155_v43 = vadd.f32 %v139_v0, %v91_v6  ;;  %v156_v44 = vadd.f32 %v140_v1, %v92_v7  ;;  %v357_v45 = vadd.f32 %v341_v2, %v325_v8  ;;  %v358_v46 = vadd.f32 %v342_v3, %v326_v9 }
  0x89   :  { %v661_v49 = vadd.f32 %v143_v11, %v95_v54 }
  0x8b   :  { %v575_v29 = vpop.permute.xlu0 %78 }
  0x8c   :  { %v691_v20 = vmul.f32 %v575_v29, %v595_v40 }
  0x8d   :  { %v577_v30 = vpop.permute.xlu1 %82 }
  0x8e   :  { %894 = vst [vmem:[#allocation9_spill] sm:$0xff] %v577_v30 }
  0x8f   :  { %v167_v31 = vpop.permute.xlu2 %166 }
  0x90   :  { %v197_v12 = vmul.f32 %v167_v31, %v619_v62  ;;  %v198_v13 = vmul.f32 %v167_v31, %v621_v63  ;;  %v367_v16 = vmul.f32 %v627_v4, %v167_v31  ;;  %v368_v17 = vmul.f32 %v629_v5, %v167_v31  ;;  %v655_v31 = vld [vmem:[#allocation2 + $0x38] sm:$0xff] }
  0x92   :  { %v213_v50 = vadd.f32 %v197_v12, %v149_v58  ;;  %v214_v51 = vadd.f32 %v198_v13, %v150_v59  ;;  %v383_v30 = vadd.f32 %v367_v16, %v351_v60  ;;  %v160_v12 = vadd.f32 %v144_v21, %v96_v55 }
  0x93   :  { %v681_v13 = vadd.f32 %v345_v22, %v329_v56  ;;  %v683_v16 = vadd.f32 %v346_v23, %v330_v57 }
  0x94   :  { %v579_v32 = vpop.permute.xlu0 %106 }
  0x95   :  { %v135_v0 = vmul.f32 %v579_v32, %v587_v36  ;;  %v136_v1 = vmul.f32 %v579_v32, %v589_v37  ;;  %v337_v58 = vmul.f32 %v591_v38, %v579_v32  ;;  %v338_v57 = vmul.f32 %v593_v39, %v579_v32 }
  0x96   :  { %v581_v33 = vpop.permute.xlu1 %110 }
  0x97   :  { %v583_v34 = vpop.permute.xlu2 %178  ;;  %v151_v55 = vadd.f32 %v135_v0, %v87_v10  ;;  %v152_v56 = vadd.f32 %v136_v1, %v88_v14  ;;  %v353_v21 = vadd.f32 %v337_v58, %v321_v15 }
  0x98   :  { %v203_v59 = vmul.f32 %v583_v34, %v619_v62  ;;  %v204_v60 = vmul.f32 %v583_v34, %v621_v63  ;;  %v374_v7 = vmul.f32 %v629_v5, %v583_v34 }
  0x9a   :  { %v219_v23 = vadd.f32 %v203_v59, %v155_v43 }
  0x9c   :  { %v605_v47 = vpop.permute.xlu0 %126 }
  0x9d   :  { %v145_v0 = vmul.f32 %v605_v47, %v587_v36 }
  0x9e   :  { %v611_v52 = vpop.permute.xlu1 %118 }
  0x9f   :  { %895 = vst [vmem:[#allocation10_spill] sm:$0xff] %v611_v52  ;;  %v613_v53 = vpop.permute.xlu2 %186  ;;  %v97_v52 = vmul.f32 %v575_v29, %v585_v35 }
  0xa5   :  { %v643_v18 = vpop.permute.xlu0 %170 }
  0xa6   :  { %v651_v25 = vpop.permute.xlu1 %130  ;;  %v199_v43 = vmul.f32 %v643_v18, %v619_v62  ;;  %v370_v58 = vmul.f32 %v629_v5, %v643_v18 }
  0xa7   :  { %896 = vst [vmem:[#allocation11_spill] sm:$0xff] %v651_v25  ;;  %v384_v25 = vadd.f32 %v368_v17, %v352_v61  ;;  %v373_v61 = vmul.f32 %v627_v4, %v583_v34  ;;  %v695_v34 = vmul.f32 %v597_v41, %v575_v29 }
  0xa8   :  { %v231_v28 = vpop.permute.xlu2 %230 }
  0xa9   :  { %v261_v2 = vmul.f32 %v231_v28, %v653_v27  ;;  %v262_v3 = vmul.f32 %v231_v28, %v655_v31  ;;  %v399_v6 = vmul.f32 %v657_v48, %v231_v28  ;;  %v400_v54 = vmul.f32 %v659_v26, %v231_v28 }
  0xab   :  { %v277_v8 = vadd.f32 %v261_v2, %v213_v50  ;;  %v278_v9 = vadd.f32 %v262_v3, %v214_v51  ;;  %v415_v11 = vadd.f32 %v399_v6, %v383_v30  ;;  %v416_v17 = vadd.f32 %v400_v54, %v384_v25 }
  0xac   :  { %v699_v30 = vmul.f32 %v599_v42, %v575_v29  ;;  %v220_v25 = vadd.f32 %v204_v60, %v156_v44  ;;  %v389_v50 = vadd.f32 %v373_v61, %v357_v45  ;;  %v390_v51 = vadd.f32 %v374_v7, %v358_v46 }
  0xad   :  { %v685_v28 = vpop.permute.xlu0 %190  ;;  %294 = vst.msk [vmem:[#allocation5] sm:$0xff] %vm293_vm0, %v277_v8  ;;  %v200_v44 = vmul.f32 %v643_v18, %v621_v63  ;;  %v369_v45 = vmul.f32 %v627_v4, %v643_v18  ;;  %v354_v46 = vadd.f32 %v338_v57, %v646_v19  ;;  %v207_v6 = vmul.f32 %v613_v53, %v619_v62 }
  0xae   :  { %295 = vst.msk [vmem:[#allocation5 + $0x8] sm:$0xff] %vm293_vm0, %v278_v9  ;;  %v208_v54 = vmul.f32 %v613_v53, %v621_v63  ;;  %v146_v60 = vmul.f32 %v605_v47, %v589_v37  ;;  %v347_v61 = vmul.f32 %v591_v38, %v605_v47  ;;  %v348_v19 = vmul.f32 %v593_v39, %v605_v47 }
  0xaf   :  { %v705_v22 = vpop.permute.xlu1 %174  ;;  %432 = vst.msk [vmem:[#allocation5 + $0x80] sm:$0xff] %vm293_vm0, %v415_v11  ;;  %v377_v7 = vmul.f32 %v627_v4, %v613_v53  ;;  %v161_v8 = vadd.f32 %v145_v0, %v97_v52  ;;  %v215_v9 = vadd.f32 %v199_v43, %v151_v55  ;;  %v216_v11 = vadd.f32 %v200_v44, %v152_v56 }
  0xb0   :  { %v243_v29 = vpop.permute.xlu2 %242  ;;  %433 = vst.msk [vmem:[#allocation5 + $0x88] sm:$0xff] %vm293_vm0, %v416_v17  ;;  %v385_v17 = vadd.f32 %v369_v45, %v353_v21  ;;  %v378_v52 = vmul.f32 %v629_v5, %v613_v53  ;;  %v386_v55 = vadd.f32 %v370_v58, %v354_v46  ;;  %v223_v56 = vadd.f32 %v207_v6, %v661_v49 }
  0xb1   :  { %v267_v10 = vmul.f32 %v243_v29, %v653_v27  ;;  %v268_v14 = vmul.f32 %v243_v29, %v655_v31  ;;  %v405_v32 = vmul.f32 %v657_v48, %v243_v29  ;;  %v406_v15 = vmul.f32 %v659_v26, %v243_v29 }
  0xb2   :  { %v224_v21 = vadd.f32 %v208_v54, %v160_v12  ;;  %v210_v0 = vmul.f32 %v685_v28, %v621_v63  ;;  %v379_v53 = vmul.f32 %v627_v4, %v685_v28  ;;  %v162_v45 = vadd.f32 %v146_v60, %v691_v20 }
  0xb3   :  { %v283_v1 = vadd.f32 %v267_v10, %v219_v23  ;;  %v284_v2 = vadd.f32 %v268_v14, %v220_v25  ;;  %v421_v3 = vadd.f32 %v405_v32, %v389_v50  ;;  %v422_v59 = vadd.f32 %v406_v15, %v390_v51 }
  0xb4   :  { %v393_v32 = vadd.f32 %v377_v7, %v681_v13  ;;  %v209_v15 = vmul.f32 %v685_v28, %v619_v62  ;;  %v363_v46 = vadd.f32 %v347_v61, %v695_v34  ;;  %v226_v60 = vadd.f32 %v210_v0, %v162_v45  ;;  %v897_v0 = vld [vmem:[#allocation8_spill] sm:$0xff] }
  0xb5   :  { %300 = vst.msk [vmem:[#allocation5 + $0x30] sm:$0xff] %vm293_vm0, %v283_v1  ;;  %v380_v1 = vmul.f32 %v629_v5, %v685_v28 }
  0xb6   :  { %301 = vst.msk [vmem:[#allocation5 + $0x38] sm:$0xff] %vm293_vm0, %v284_v2  ;;  %v235_v18 = vpop.permute.xlu0 %234  ;;  %v394_v2 = vadd.f32 %v378_v52, %v683_v16  ;;  %v225_v20 = vadd.f32 %v209_v15, %v161_v8  ;;  %v395_v34 = vadd.f32 %v379_v53, %v363_v46  ;;  %v90_v52 = vmul.f32 %v573_v24, %v595_v40 }
  0xb7   :  { %438 = vst.msk [vmem:[#allocation5 + $0xb0] sm:$0xff] %vm293_vm0, %v421_v3  ;;  %v263_v57 = vmul.f32 %v235_v18, %v653_v27  ;;  %v264_v23 = vmul.f32 %v235_v18, %v655_v31  ;;  %v401_v47 = vmul.f32 %v657_v48, %v235_v18  ;;  %v402_v25 = vmul.f32 %v659_v26, %v235_v18  ;;  %v743_v50 = vpop.permute.xlu1 %182 }
  0xb8   :  { %439 = vst.msk [vmem:[#allocation5 + $0xb8] sm:$0xff] %vm293_vm0, %v422_v59  ;;  %v251_v51 = vpop.permute.xlu2 %250  ;;  %v364_v3 = vadd.f32 %v348_v19, %v699_v30  ;;  %v137_v18 = vmul.f32 %v581_v33, %v587_v36  ;;  %v93_v53 = vmul.f32 %v897_v0, %v585_v35 }
  0xb9   :  { %v279_v29 = vadd.f32 %v263_v57, %v215_v9  ;;  %v280_v10 = vadd.f32 %v264_v23, %v216_v11  ;;  %v417_v14 = vadd.f32 %v401_v47, %v385_v17  ;;  %v418_v43 = vadd.f32 %v402_v25, %v386_v55 }
  0xba   :  { %v271_v49 = vmul.f32 %v251_v51, %v653_v27  ;;  %v272_v12 = vmul.f32 %v251_v51, %v655_v31  ;;  %v409_v44 = vmul.f32 %v657_v48, %v251_v51  ;;  %v410_v13 = vmul.f32 %v659_v26, %v251_v51 }
  0xbb   :  { %296 = vst.msk [vmem:[#allocation5 + $0x10] sm:$0xff] %vm293_vm0, %v279_v29  ;;  %v396_v9 = vadd.f32 %v380_v1, %v364_v3  ;;  %v138_v57 = vmul.f32 %v581_v33, %v589_v37  ;;  %v339_v23 = vmul.f32 %v591_v38, %v581_v33  ;;  %v89_v25 = vmul.f32 %v573_v24, %v585_v35  ;;  %v898_v3 = vld [vmem:[#allocation10_spill] sm:$0xff] }
  0xbc   :  { %297 = vst.msk [vmem:[#allocation5 + $0x18] sm:$0xff] %vm293_vm0, %v280_v10  ;;  %v287_v6 = vadd.f32 %v271_v49, %v223_v56  ;;  %v288_v54 = vadd.f32 %v272_v12, %v224_v21  ;;  %v425_v58 = vadd.f32 %v409_v44, %v393_v32  ;;  %v426_v59 = vadd.f32 %v410_v13, %v394_v2 }
  0xbd   :  { %434 = vst.msk [vmem:[#allocation5 + $0x90] sm:$0xff] %vm293_vm0, %v417_v14  ;;  %v323_v55 = vmul.f32 %v597_v41, %v573_v24  ;;  %v340_v56 = vmul.f32 %v593_v39, %v581_v33  ;;  %v201_v21 = vmul.f32 %v705_v22, %v619_v62  ;;  %v202_v51 = vmul.f32 %v705_v22, %v621_v63 }
  0xbe   :  { %435 = vst.msk [vmem:[#allocation5 + $0x98] sm:$0xff] %vm293_vm0, %v418_v43  ;;  %v255_v61 = vpop.permute.xlu0 %254  ;;  %v371_v29 = vmul.f32 %v627_v4, %v705_v22  ;;  %v324_v10 = vmul.f32 %v599_v42, %v573_v24  ;;  %v153_v14 = vadd.f32 %v137_v18, %v89_v25  ;;  %v154_v32 = vadd.f32 %v138_v57, %v90_v52  ;;  %v899_v57 = vld [vmem:[#allocation9_spill] sm:$0xff] }
  0xbf   :  { %304 = vst.msk [vmem:[#allocation5 + $0x50] sm:$0xff] %vm293_vm0, %v287_v6  ;;  %v273_v28 = vmul.f32 %v255_v61, %v653_v27  ;;  %v274_v16 = vmul.f32 %v255_v61, %v655_v31  ;;  %v411_v30 = vmul.f32 %v657_v48, %v255_v61  ;;  %v412_v19 = vmul.f32 %v659_v26, %v255_v61  ;;  %v775_v7 = vpop.permute.xlu1 %194 }
  0xc0   :  { %305 = vst.msk [vmem:[#allocation5 + $0x58] sm:$0xff] %vm293_vm0, %v288_v54  ;;  %v355_v15 = vadd.f32 %v339_v23, %v323_v55  ;;  %v372_v33 = vmul.f32 %v629_v5, %v705_v22  ;;  %v94_v43 = vmul.f32 %v897_v0, %v595_v40  ;;  %v327_v49 = vmul.f32 %v597_v41, %v897_v0 }
  0xc1   :  { %442 = vst.msk [vmem:[#allocation5 + $0xd0] sm:$0xff] %vm293_vm0, %v425_v58  ;;  %v289_v8 = vadd.f32 %v273_v28, %v225_v20  ;;  %v290_v11 = vadd.f32 %v274_v16, %v226_v60  ;;  %v427_v17 = vadd.f32 %v411_v30, %v395_v34  ;;  %v428_v47 = vadd.f32 %v412_v19, %v396_v9 }
  0xc2   :  { %443 = vst.msk [vmem:[#allocation5 + $0xd8] sm:$0xff] %vm293_vm0, %v426_v59  ;;  %v356_v24 = vadd.f32 %v340_v56, %v324_v10  ;;  %v217_v12 = vadd.f32 %v201_v21, %v153_v14  ;;  %v218_v44 = vadd.f32 %v202_v51, %v154_v32  ;;  %v387_v13 = vadd.f32 %v371_v29, %v355_v15  ;;  %v900_v10 = vld [vmem:[#allocation11_spill] sm:$0xff] }
  0xc3   :  { %306 = vst.msk [vmem:[#allocation5 + $0x60] sm:$0xff] %vm293_vm0, %v289_v8  ;;  %v141_v6 = vmul.f32 %v898_v3, %v587_v36  ;;  %v142_v54 = vmul.f32 %v898_v3, %v589_v37  ;;  %v343_v58 = vmul.f32 %v591_v38, %v898_v3  ;;  %v344_v20 = vmul.f32 %v593_v39, %v898_v3 }
  0xc4   :  { %307 = vst.msk [vmem:[#allocation5 + $0x68] sm:$0xff] %vm293_vm0, %v290_v11  ;;  %v388_v59 = vadd.f32 %v372_v33, %v356_v24  ;;  %v205_v28 = vmul.f32 %v743_v50, %v619_v62  ;;  %v206_v16 = vmul.f32 %v743_v50, %v621_v63  ;;  %v375_v30 = vmul.f32 %v627_v4, %v743_v50 }
  0xc5   :  { %444 = vst.msk [vmem:[#allocation5 + $0xe0] sm:$0xff] %vm293_vm0, %v427_v17  ;;  %v328_v9 = vmul.f32 %v599_v42, %v897_v0  ;;  %v157_v8 = vadd.f32 %v141_v6, %v93_v53  ;;  %v158_v11 = vadd.f32 %v142_v54, %v94_v43  ;;  %v359_v17 = vadd.f32 %v343_v58, %v327_v49 }
  0xc6   :  { %445 = vst.msk [vmem:[#allocation5 + $0xe8] sm:$0xff] %vm293_vm0, %v428_v47  ;;  %v376_v18 = vmul.f32 %v629_v5, %v743_v50  ;;  %v99_v23 = vmul.f32 %v899_v57, %v585_v35  ;;  %v100_v47 = vmul.f32 %v899_v57, %v595_v40  ;;  %v333_v25 = vmul.f32 %v597_v41, %v899_v57 }
  0xc7   :  { %v360_v52 = vadd.f32 %v344_v20, %v328_v9  ;;  %v221_v55 = vadd.f32 %v205_v28, %v157_v8  ;;  %v222_v56 = vadd.f32 %v206_v16, %v158_v11  ;;  %v391_v21 = vadd.f32 %v375_v30, %v359_v17 }
  0xc8   :  { %v239_v45 = vpop.permute.xlu1 %238  ;;  %v147_v41 = vmul.f32 %v900_v10, %v587_v36  ;;  %v148_v14 = vmul.f32 %v900_v10, %v589_v37  ;;  %v349_v32 = vmul.f32 %v591_v38, %v900_v10  ;;  %v350_v33 = vmul.f32 %v593_v39, %v900_v10 }
  0xc9   :  { %v265_v46 = vmul.f32 %v239_v45, %v653_v27  ;;  %v266_v22 = vmul.f32 %v239_v45, %v655_v31  ;;  %v403_v1 = vmul.f32 %v657_v48, %v239_v45  ;;  %v404_v2 = vmul.f32 %v659_v26, %v239_v45 }
  0xca   :  { %v392_v15 = vadd.f32 %v376_v18, %v360_v52  ;;  %v211_v49 = vmul.f32 %v775_v7, %v619_v62  ;;  %v212_v24 = vmul.f32 %v775_v7, %v621_v63  ;;  %v381_v36 = vmul.f32 %v627_v4, %v775_v7 }
  0xcb   :  { %v281_v60 = vadd.f32 %v265_v46, %v217_v12  ;;  %v282_v34 = vadd.f32 %v266_v22, %v218_v44  ;;  %v419_v61 = vadd.f32 %v403_v1, %v387_v13  ;;  %v420_v19 = vadd.f32 %v404_v2, %v388_v59 }
  0xcc   :  { %v334_v38 = vmul.f32 %v599_v42, %v899_v57  ;;  %v163_v12 = vadd.f32 %v147_v41, %v99_v23  ;;  %v164_v39 = vadd.f32 %v148_v14, %v100_v47  ;;  %v365_v44 = vadd.f32 %v349_v32, %v333_v25 }
  0xcd   :  { %298 = vst.msk [vmem:[#allocation5 + $0x20] sm:$0xff] %vm293_vm0, %v281_v60  ;;  %v382_v13 = vmul.f32 %v629_v5, %v775_v7 }
  0xce   :  { %299 = vst.msk [vmem:[#allocation5 + $0x28] sm:$0xff] %vm293_vm0, %v282_v34  ;;  %v366_v62 = vadd.f32 %v350_v33, %v334_v38  ;;  %v227_v63 = vadd.f32 %v211_v49, %v163_v12  ;;  %v228_v4 = vadd.f32 %v212_v24, %v164_v39  ;;  %v397_v45 = vadd.f32 %v381_v36, %v365_v44 }
  0xcf   :  { %436 = vst.msk [vmem:[#allocation5 + $0xa0] sm:$0xff] %vm293_vm0, %v419_v61 }
  0xd0   :  { %437 = vst.msk [vmem:[#allocation5 + $0xa8] sm:$0xff] %vm293_vm0, %v420_v19  ;;  %v247_v50 = vpop.permute.xlu1 %246  ;;  %v398_v5 = vadd.f32 %v382_v13, %v366_v62 }
  0xd1   :  { %v269_v51 = vmul.f32 %v247_v50, %v653_v27  ;;  %v270_v29 = vmul.f32 %v247_v50, %v655_v31  ;;  %v407_v35 = vmul.f32 %v657_v48, %v247_v50  ;;  %v408_v40 = vmul.f32 %v659_v26, %v247_v50 }
  0xd3   :  { %v285_v0 = vadd.f32 %v269_v51, %v221_v55  ;;  %v286_v53 = vadd.f32 %v270_v29, %v222_v56  ;;  %v423_v43 = vadd.f32 %v407_v35, %v391_v21  ;;  %v424_v37 = vadd.f32 %v408_v40, %v392_v15 }
  0xd5   :  { %302 = vst.msk [vmem:[#allocation5 + $0x40] sm:$0xff] %vm293_vm0, %v285_v0 }
  0xd6   :  { %303 = vst.msk [vmem:[#allocation5 + $0x48] sm:$0xff] %vm293_vm0, %v286_v53 }
  0xd7   :  { %440 = vst.msk [vmem:[#allocation5 + $0xc0] sm:$0xff] %vm293_vm0, %v423_v43 }
  0xd8   :  { %441 = vst.msk [vmem:[#allocation5 + $0xc8] sm:$0xff] %vm293_vm0, %v424_v37  ;;  %v259_v46 = vpop.permute.xlu1 %258 }
  0xd9   :  { %v275_v42 = vmul.f32 %v259_v46, %v653_v27  ;;  %v276_v22 = vmul.f32 %v259_v46, %v655_v31  ;;  %v413_v1 = vmul.f32 %v657_v48, %v259_v46  ;;  %v414_v2 = vmul.f32 %v659_v26, %v259_v46 }
  0xdb   :  { %v291_v7 = vadd.f32 %v275_v42, %v227_v63  ;;  %v292_v3 = vadd.f32 %v276_v22, %v228_v4  ;;  %v429_v6 = vadd.f32 %v413_v1, %v397_v45  ;;  %v430_v54 = vadd.f32 %v414_v2, %v398_v5 }
  0xdd   :  { %308 = vst.msk [vmem:[#allocation5 + $0x70] sm:$0xff] %vm293_vm0, %v291_v7 }
  0xde   :  { %309 = vst.msk [vmem:[#allocation5 + $0x78] sm:$0xff] %vm293_vm0, %v292_v3 }
  0xdf   :  { %446 = vst.msk [vmem:[#allocation5 + $0xf0] sm:$0xff] %vm293_vm0, %v429_v6 }
  0xe0   :  { %447 = vst.msk [vmem:[#allocation5 + $0xf8] sm:$0xff] %vm293_vm0, %v430_v54 }
  0xe1   :  { %460 = dma.vmem_to_hbm [thread:$0]  %s453_s1, 4096, %s455_s20, [#allocation4], %s540_s14, %s540_s14, %s541_s15  }
  0xe2   :  { %537 = dma.done.wait [#allocation4], 4096  }
  0xe3   :  { %538 = vsyncadd [#allocation4], 4294963200 }
  0xe4   :  { %465 = vsyncpa [#allocation3], 1 }
  0xe5   :  { %466 = vsyncpa [#allocation4], 1 }

</bundles_post_ra>
